<compile_context>
chip_gen: v7x
topology: tpu7x:2x2x1
jax: 0.10.0
libtpu: 0.0.40
codegen_flags: <defaults>
</compile_context>

<pallas_src>
import jax
import jax.numpy as jnp
from jax.experimental import pallas as pl
from jax.experimental.pallas import tpu as pltpu


def _pairwise_loss_kernel(row_ref, col_ref, loss_ref):
    # row_ref: (TB, 3, N)  lane-major:    [output, target, mask][b, :, k]
    # col_ref: (TB, N, 3)  sublane-major: [output, target, mask][b, j, :]
    ok = row_ref[:, 0:1, :]            # (TB, 1, N)  output[b, k]
    tk = row_ref[:, 1:2, :]            # (TB, 1, N)  target[b, k]
    mk = row_ref[:, 2:3, :]            # (TB, 1, N)  mask[b, k]
    oj = col_ref[:, :, 0:1]            # (TB, N, 1)  output[b, j]
    tj = col_ref[:, :, 1:2]            # (TB, N, 1)  target[b, j]
    mj = col_ref[:, :, 2:3]            # (TB, N, 1)  mask[b, j]

    # sigmoid(x) == 0.5 * (1 + tanh(x/2)): single EUP push per vreg.
    sig = 0.5 * (1.0 + jnp.tanh(2.5 * (oj - ok)))          # (TB, N, N)
    tgt = (tj > tk).astype(jnp.float32)                    # 1 where t_j > t_k
    neq = (tj != tk).astype(jnp.float32)                   # drops the 0.5 branch
    diff = sig - tgt
    loss_ref[...] = (diff * diff * neq * (mj * mk)).astype(loss_ref.dtype)


def _choose_batch_tile(B, max_tb=8):
    """Largest divisor of B that keeps >=2 grid steps (v7x megacore) and <=max_tb."""
    if B <= 1:
        return 1
    cap = max(1, min(max_tb, B // 2))
    for tb in range(cap, 0, -1):
        if B % tb == 0:
            return tb
    return 1


def pairwise_loss(output, target, mask):
    """Pallas TPU implementation of PairwiseLoss.forward.

    output: (B, N) float   -- model scores per class
    target: (B, N) int     -- sentence-level labels (compared pairwise)
    mask:   (B, N)         -- 0/1 validity mask
    returns: (B, N, N) float32 per-pair loss (reduction='none').
    """
    B, N = output.shape
    assert target.shape == (B, N) and mask.shape == (B, N)

    out_f = output.astype(jnp.float32)
    # Labels are small integers -> exact in f32, so >/!= compares are unchanged.
    tgt_f = target.astype(jnp.float32)
    msk_f = mask.astype(jnp.float32)

    # One lane-major and one sublane-major packed copy -> 2 input DMAs / step.
    packed_row = jnp.stack([out_f, tgt_f, msk_f], axis=1)   # (B, 3, N)
    packed_col = jnp.stack([out_f, tgt_f, msk_f], axis=2)   # (B, N, 3)

    tb = _choose_batch_tile(B)
    grid = (B // tb,)

    row_spec = pl.BlockSpec((tb, 3, N), lambda b: (b, 0, 0))
    col_spec = pl.BlockSpec((tb, N, 3), lambda b: (b, 0, 0))
    out_spec = pl.BlockSpec((tb, N, N), lambda b: (b, 0, 0))

    itemsize = 4
    cost = pl.CostEstimate(
        flops=11 * B * N * N,
        transcendentals=B * N * N,                        # one tanh per pair
        bytes_accessed=B * N * N * itemsize + 6 * B * N * itemsize,
    )

    return pl.pallas_call(
        _pairwise_loss_kernel,
        out_shape=jax.ShapeDtypeStruct((B, N, N), jnp.float32),
        grid_spec=pltpu.PrefetchScalarGridSpec(
            num_scalar_prefetch=0,
            grid=grid,
            in_specs=[row_spec, col_spec],
            out_specs=out_spec,
        ),
        compiler_params=pltpu.CompilerParams(
            dimension_semantics=("parallel",),
        ),
        cost_estimate=cost,
    )(packed_row, packed_col)


def _reference_pairwise_loss(output, target, mask):
    """Pure-JAX reference matching the PyTorch module step-by-step."""
    m = mask.astype(jnp.float32)
    m2 = m[:, :, None] * m[:, None, :]
    o = output.astype(jnp.float32)
    diff = o[:, :, None] - o[:, None, :]
    pair = jax.nn.sigmoid(5.0 * diff) * m2
    tj = target[:, :, None]
    tk = target[:, None, :]
    tgt = jnp.where(tj > tk, 1.0, jnp.where(tj < tk, 0.0, 0.5)).astype(jnp.float32) * m2
    half = (tgt != 0.5).astype(jnp.float32)
    pair = pair * half
    tgt = tgt * half
    return ((pair - tgt) ** 2) * m2


if __name__ == "__main__":
    # Small shapes consistent with the module: batch_size=4, n_classes=128.
    B, N = 4, 128
    key = jax.random.PRNGKey(0)
    k1, k2 = jax.random.split(key)

    output = jax.random.normal(k1, (B, N), dtype=jnp.float32)        # model scores
    target = jax.random.randint(k2, (B, N), 0, 5).astype(jnp.int32)  # ranking labels
    lengths = jnp.array([128, 96, 64, 100], dtype=jnp.int32)
    mask = (jnp.arange(N)[None, :] < lengths[:, None]).astype(jnp.float32)

    loss = jax.block_until_ready(pairwise_loss(output, target, mask))
    ref = _reference_pairwise_loss(output, target, mask)

    assert loss.shape == (B, N, N)
    # Tolerance allows for the tanh-based vs exp-based sigmoid formulation
    # (both are f32 approximations of the same function; loss values are O(1)).
    max_err = float(jnp.max(jnp.abs(loss - ref)))
    assert jnp.allclose(loss, ref, rtol=1e-3, atol=5e-4), max_err

    print("KERNEL_OK")
</pallas_src>

<mosaic_0001>
module attributes {stable_mosaic.version = 11 : i64} {
  func.func @_pairwise_loss_kernel(%arg0: i32, %arg1: memref<2x3x128xf32, #tpu.memory_space<vmem>>, %arg2: memref<2x128x3xf32, #tpu.memory_space<vmem>>, %arg3: memref<2x128x128xf32, #tpu.memory_space<vmem>>) attributes {dimension_semantics = [#tpu.dimension_semantics<parallel>], iteration_bounds = array<i64: 2>, scalar_prefetch = 0 : i64, scratch_operands = 0 : i64, tpu.core_type = #tpu.core_type<tc>, window_params = [{transform_indices = @transform_0, window_bounds = array<i64: 2, 3, 128>}, {transform_indices = @transform_1, window_bounds = array<i64: 2, 128, 3>}, {transform_indices = @transform_2, window_bounds = array<i64: 2, 128, 128>}]} {
    %c0 = arith.constant 0 : index
    %c0_0 = arith.constant 0 : index
    %c0_1 = arith.constant 0 : index
    %0 = vector.load %arg1[%c0, %c0_0, %c0_1] : memref<2x3x128xf32, #tpu.memory_space<vmem>>, vector<2x1x128xf32>
    %c0_2 = arith.constant 0 : index
    %c1 = arith.constant 1 : index
    %c0_3 = arith.constant 0 : index
    %1 = vector.load %arg1[%c0_2, %c1, %c0_3] : memref<2x3x128xf32, #tpu.memory_space<vmem>>, vector<2x1x128xf32>
    %c0_4 = arith.constant 0 : index
    %c2 = arith.constant 2 : index
    %c0_5 = arith.constant 0 : index
    %2 = vector.load %arg1[%c0_4, %c2, %c0_5] : memref<2x3x128xf32, #tpu.memory_space<vmem>>, vector<2x1x128xf32>
    %c0_6 = arith.constant 0 : index
    %c0_7 = arith.constant 0 : index
    %c0_8 = arith.constant 0 : index
    %3 = vector.load %arg2[%c0_6, %c0_7, %c0_8] : memref<2x128x3xf32, #tpu.memory_space<vmem>>, vector<2x128x1xf32>
    %c0_9 = arith.constant 0 : index
    %c0_10 = arith.constant 0 : index
    %c1_11 = arith.constant 1 : index
    %4 = vector.load %arg2[%c0_9, %c0_10, %c1_11] : memref<2x128x3xf32, #tpu.memory_space<vmem>>, vector<2x128x1xf32>
    %c0_12 = arith.constant 0 : index
    %c0_13 = arith.constant 0 : index
    %c2_14 = arith.constant 2 : index
    %5 = vector.load %arg2[%c0_12, %c0_13, %c2_14] : memref<2x128x3xf32, #tpu.memory_space<vmem>>, vector<2x128x1xf32>
    %6 = vector.broadcast %3 : vector<2x128x1xf32> to vector<2x128x128xf32>
    %7 = vector.broadcast %0 : vector<2x1x128xf32> to vector<2x128x128xf32>
    %8 = arith.subf %6, %7 : vector<2x128x128xf32>
    %cst = arith.constant 2.500000e+00 : f32
    %9 = vector.broadcast %cst : f32 to vector<2x128x128xf32>
    %10 = arith.mulf %9, %8 : vector<2x128x128xf32>
    %11 = math.tanh %10 : vector<2x128x128xf32>
    %cst_15 = arith.constant 1.000000e+00 : f32
    %12 = vector.broadcast %cst_15 : f32 to vector<2x128x128xf32>
    %13 = arith.addf %12, %11 : vector<2x128x128xf32>
    %cst_16 = arith.constant 5.000000e-01 : f32
    %14 = vector.broadcast %cst_16 : f32 to vector<2x128x128xf32>
    %15 = arith.mulf %14, %13 : vector<2x128x128xf32>
    %16 = vector.broadcast %4 : vector<2x128x1xf32> to vector<2x128x128xf32>
    %17 = vector.broadcast %1 : vector<2x1x128xf32> to vector<2x128x128xf32>
    %18 = arith.cmpf ogt, %16, %17 : vector<2x128x128xf32>
    %19 = arith.extui %18 : vector<2x128x128xi1> to vector<2x128x128xi32>
    %20 = arith.sitofp %19 : vector<2x128x128xi32> to vector<2x128x128xf32>
    %21 = vector.broadcast %4 : vector<2x128x1xf32> to vector<2x128x128xf32>
    %22 = vector.broadcast %1 : vector<2x1x128xf32> to vector<2x128x128xf32>
    %23 = arith.cmpf one, %21, %22 : vector<2x128x128xf32>
    %24 = arith.extui %23 : vector<2x128x128xi1> to vector<2x128x128xi32>
    %25 = arith.sitofp %24 : vector<2x128x128xi32> to vector<2x128x128xf32>
    %26 = arith.subf %15, %20 : vector<2x128x128xf32>
    %27 = arith.mulf %26, %26 : vector<2x128x128xf32>
    %28 = arith.mulf %27, %25 : vector<2x128x128xf32>
    %29 = vector.broadcast %5 : vector<2x128x1xf32> to vector<2x128x128xf32>
    %30 = vector.broadcast %2 : vector<2x1x128xf32> to vector<2x128x128xf32>
    %31 = arith.mulf %29, %30 : vector<2x128x128xf32>
    %32 = arith.mulf %28, %31 : vector<2x128x128xf32>
    %c0_17 = arith.constant 0 : index
    %c0_18 = arith.constant 0 : index
    %c0_19 = arith.constant 0 : index
    %33 = vector.load %arg3[%c0_17, %c0_18, %c0_19] : memref<2x128x128xf32, #tpu.memory_space<vmem>>, vector<2x128x128xf32>
    tpu.vector_store %arg3[%c0_17, %c0_18, %c0_19], %32 {strides = array<i32>} : memref<2x128x128xf32, #tpu.memory_space<vmem>>, vector<2x128x128xf32>,
    return
  }
  func.func @transform_0(%arg0: i32) -> (i32, i32, i32) {
    %c0_i32 = arith.constant 0 : i32
    %c0_i32_0 = arith.constant 0 : i32
    %c0_i32_1 = arith.constant 0 : i32
    return %arg0, %c0_i32, %c0_i32_0 : i32, i32, i32
  }
  func.func @transform_1(%arg0: i32) -> (i32, i32, i32) {
    %c0_i32 = arith.constant 0 : i32
    %c0_i32_0 = arith.constant 0 : i32
    %c0_i32_1 = arith.constant 0 : i32
    return %arg0, %c0_i32, %c0_i32_0 : i32, i32, i32
  }
  func.func @transform_2(%arg0: i32) -> (i32, i32, i32) {
    %c0_i32 = arith.constant 0 : i32
    %c0_i32_0 = arith.constant 0 : i32
    %c0_i32_1 = arith.constant 0 : i32
    return %arg0, %c0_i32, %c0_i32_0 : i32, i32, i32
  }
}

</mosaic_0001>

<bundles_post_ra>
// kernel: tpu_custom_call.1
= control target key start
LH: loop header
LB: loop body
LE: loop exit
PB: predicated region body
PF: predicated region fallthrough
CT: control target
= control target key end

     0   :  { %7 = vsyncpa [#allocation3], 0  ;;  %s2365_s0 = inlined_call_operand.vmem [shape: f32[4,3,128], index: 0, kind: input, shape index: {}]   ;;  %s2366_s1 = inlined_call_operand.vmem [shape: f32[4,128,3], index: 1, kind: input, shape index: {}]   ;;  %s2367_s2 = inlined_call_operand.hbm [shape: f32[4,128,128], index: 2, kind: output, shape index: {}]  }
   0x1   :  { %9 = vsyncpa [#allocation3 + $0x1], 0  ;;  %s1571_s9 = smov 0   ;;  %s1573_s10 = smov 0  }
   0x2   :  { %s1575_s11 = smov 0   ;;  %s1577_s12 = smov 0  }
   0x3 LB: > { %s1592_s13 = sadd.s32 4294967295, %s1547_s12   ;;  %s1281_s14 = sadd.s32 4294967294, %s1547_s12   ;;  %s1547_s12 = sphi %s1577_s12, %s2373_s12   ;;  %s1543_s11 = sphi %s1575_s11, %s2372_s11   ;;  %s1539_s10 = sphi %s1573_s10, %s2371_s10   ;;  %s1535_s9 = sphi %s1571_s9, %s2370_s9  }
   0x4   : > { %s1596_s15 = sadd.s32 1, %s1547_s12   ;;  %s74_s16 = sadd.s32 1, %s1543_s11 }
   0x5   : > { %s71_s17 = ssub.s32 %s1547_s12, %s1596_s15  ;;  %p84_p0 = scmp.ne.s32.totalorder %s1543_s11, %s1539_s10 }
   0x6   : > { %p72_p1 = scmp.eq.s32.totalorder %s71_s17, 0  ;;  %p85_p2 = scmp.eq.s32.totalorder %s1592_s13, 1 }
   0x7   : > { %p90_p3 = scmp.ne.s32.totalorder %s1539_s10, %s1535_s9  ;;  %p91_p4 = scmp.eq.s32.totalorder %s1281_s14, 1 }
   0x8   : > { %s1607_s18 = scalar_select %p72_p1, %s1543_s11, %s74_s16  }
   0x9   : > { %p1609_p5 = por %p85_p2, %p84_p0  ;;  %p1613_p6 = por %p91_p4, %p90_p3 }
   0xa   : > { %p1284_p7 = scmp.ge.s32.totalorder %s1547_s12, 1  ;;  %p128_p8 = scmp.lt.s32.totalorder %s1547_s12, 3 }
   0xc   : > { %p129_p9 = pnand %p1284_p7, %p128_p8 }
   0xd   : > { %s1286_s21 = sshll.u32 (!%p129_p9), %s1592_s13, 1  ;;  %v1549_v0 = vmov (!%p129_p9), 0   ;;  %v1550_v33 = vmov (!%p129_p9), 1   ;;  %v1551_v39 = vmov (!%p129_p9), 2   ;;  %s153_s30 = sand.u32 (!%p129_p9), 1, %s1539_s10  }
   0xe   : > { %132 = sbr.rel (%p129_p9) target bundleno = 366 (0x16e), region = 28  ;;  %1416 = vset.pattern.permute.xlu1 (!%p129_p9), %v1549_v0  ;;  %1415 = vset.pattern.permute.xlu0 (!%p129_p9), %v1549_v0  ;;  %p157_p10 = scmp.lt.s32.totalorder (!%p129_p9), %s1286_s21, 3 }
   0xf   : > { %s1285_s3 = sshll.u32 (!%p129_p9), %s153_s30, 8  ;;  %s1369_s5 = sshll.u32 (!%p129_p9), %s1592_s13, 12 }
  0x10   : > { %s2216_s4 = scalar_lea.vmem (!%p129_p9), [#allocation2], %s1285_s3  ;;  %s2316_s14 = scalar_lea.hbm (!%p129_p9), %s2367_s2, %s1369_s5 }
  0x11   : > { %s1207_s6 = sshll.u32 (!%p129_p9), %s2216_s4, 4  ;;  %s2324_s13 = scalar_lea.sflag (!%p129_p9), [#allocation3], %s153_s30  ;;  %s2318_s6 = int_to_ptr.vmem [resolvable:$true] %s1207_s6 }
  0x12   : > { %s1485_s16 = scalar_lea.vmem (!%p129_p9), %s2318_s6, 4096  ;;  %s1553_s17 = smov (!%p129_p9), [#allocation2]  }
  0x13   : > { %p1486_p11 = scmp.ne.s32.totalorder (!%p129_p9), %s2318_s6, %s1485_s16 }
  0x15   : > { %s2375_s21 = smov (!%p157_p10, %s1286_s21), 3  ;;  %p1487_p12 = pnand %p1486_p11, %p1609_p5 }
  0x16   : > { %s1367_s22 = sshll.u32 %s2375_s21, 7  ;;  %s1287_s26 = sshll.u32 %s2375_s21, 2 }
  0x17   : > { %s1626_s25 = scalar_lea.vmem %s2366_s1, %s1367_s22  ;;  %s1790_s29 = scalar_lea.vmem %s2365_s0, %s1287_s26 }
  0x18   : > { %v1629_v1 = vld [vmem:[%s1626_s25 + $0x10] sm:$0xff]  ;;  %v1632_v2 = vld [vmem:[%s1626_s25] sm:$0xff]  ;;  %v1637_v3 = vld [vmem:[%s1626_s25 + $0x18] sm:$0xff]  ;;  %p1488_p13 = pneg %p1487_p12  ;;  %s1489_s21 = sshll.u32 %s1553_s17, 4  ;;  %s1490_s21 = int_to_ptr.vmem [resolvable:$false] %s1489_s21 }
  0x19   : > { %220 = vperm.xlu1 %1416, %v1629_v1   ;;  %210 = vperm.xlu0 %1415, %v1632_v2   ;;  %v1640_v4 = vld [vmem:[%s1626_s25 + $0x8] sm:$0xff]  ;;  %v1648_v6 = vld [vmem:[%s1626_s25 + $0x20] sm:$0xff]  ;;  %v1653_v7 = vld [vmem:[%s1626_s25 + $0x38] sm:$0xff]  ;;  %s1491_s22 = scalar_lea.vmem %s1490_s21, 8192  ;;  %p1492_p0 = scmp.lt.s32.totalorder %s2318_s6, %s1490_s21 }
  0x1a   : > { %v1645_v5 = vld [vmem:[%s1626_s25 + $0x28] sm:$0xff]  ;;  %v1656_v8 = vld [vmem:[%s1626_s25 + $0x30] sm:$0xff]  ;;  %v1664_v10 = vld [vmem:[%s1626_s25 + $0x40] sm:$0xff]  ;;  %p1493_p1 = scmp.lt.s32.totalorder %s1491_s22, %s1485_s16 }
  0x1b   : > { %v1661_v9 = vld [vmem:[%s1626_s25 + $0x48] sm:$0xff]  ;;  %v1669_v11 = vld [vmem:[%s1626_s25 + $0x58] sm:$0xff]  ;;  %v1672_v12 = vld [vmem:[%s1626_s25 + $0x50] sm:$0xff] }
  0x1c   : > { %v1677_v13 = vld [vmem:[%s1626_s25 + $0x68] sm:$0xff]  ;;  %v1680_v14 = vld [vmem:[%s1626_s25 + $0x60] sm:$0xff]  ;;  %v1685_v15 = vld [vmem:[%s1626_s25 + $0x78] sm:$0xff]  ;;  %p1494_p2 = por %p1493_p1, %p1492_p0 }
  0x1d   : > { %225 = vperm.xlu1 %1416, %v1637_v3   ;;  %215 = vperm.xlu0 %1415, %v1640_v4   ;;  %v1688_v16 = vld [vmem:[%s1626_s25 + $0x70] sm:$0xff]  ;;  %v1693_v17 = vld [vmem:[%s1626_s25 + $0x88] sm:$0xff]  ;;  %v1696_v18 = vld [vmem:[%s1626_s25 + $0x80] sm:$0xff] }
  0x1e   : > { %v1701_v19 = vld [vmem:[%s1626_s25 + $0x98] sm:$0xff]  ;;  %v1704_v20 = vld [vmem:[%s1626_s25 + $0x90] sm:$0xff]  ;;  %v1709_v21 = vld [vmem:[%s1626_s25 + $0xa8] sm:$0xff]  ;;  %p1495_p3 = pnand %p1494_p2, %p1488_p13 }
  0x1f   : > { %v1712_v22 = vld [vmem:[%s1626_s25 + $0xa0] sm:$0xff]  ;;  %v1717_v23 = vld [vmem:[%s1626_s25 + $0xb8] sm:$0xff]  ;;  %v1720_v24 = vld [vmem:[%s1626_s25 + $0xb0] sm:$0xff] }
  0x20   : > { %v1725_v25 = vld [vmem:[%s1626_s25 + $0xc8] sm:$0xff]  ;;  %v1728_v26 = vld [vmem:[%s1626_s25 + $0xc0] sm:$0xff]  ;;  %v1733_v27 = vld [vmem:[%s1626_s25 + $0xd8] sm:$0xff] }
  0x21   : > { %235 = vperm.xlu1 %1416, %v1645_v5   ;;  %230 = vperm.xlu0 %1415, %v1648_v6   ;;  %v1736_v28 = vld [vmem:[%s1626_s25 + $0xd0] sm:$0xff]  ;;  %v1741_v29 = vld [vmem:[%s1626_s25 + $0xe8] sm:$0xff]  ;;  %v1744_v30 = vld [vmem:[%s1626_s25 + $0xe0] sm:$0xff] }
  0x22   : > { %v1749_v31 = vld [vmem:[%s1626_s25 + $0xf8] sm:$0xff]  ;;  %v1752_v32 = vld [vmem:[%s1626_s25 + $0xf0] sm:$0xff]  ;;  %v1795_v34 = vld [vmem:[%s1790_s29] ss:$0 sm:$0xff] }
  0x25   : > { %245 = vperm.xlu1 %1416, %v1653_v7   ;;  %240 = vperm.xlu0 %1415, %v1656_v8  }
  0x29   : > { %255 = vperm.xlu1 %1416, %v1661_v9   ;;  %250 = vperm.xlu0 %1415, %v1664_v10  }
  0x2d   : > { %265 = vperm.xlu1 %1416, %v1669_v11   ;;  %260 = vperm.xlu0 %1415, %v1672_v12  }
  0x31   : > { %275 = vperm.xlu1 %1416, %v1677_v13   ;;  %270 = vperm.xlu0 %1415, %v1680_v14  }
  0x35   : > { %285 = vperm.xlu1 %1416, %v1685_v15   ;;  %280 = vperm.xlu0 %1415, %v1688_v16  }
  0x39   : > { %295 = vperm.xlu1 %1416, %v1693_v17   ;;  %290 = vperm.xlu0 %1415, %v1696_v18  }
  0x3d   : > { %305 = vperm.xlu1 %1416, %v1701_v19   ;;  %300 = vperm.xlu0 %1415, %v1704_v20  }
  0x41   : > { %315 = vperm.xlu1 %1416, %v1709_v21   ;;  %310 = vperm.xlu0 %1415, %v1712_v22  }
  0x45   : > { %325 = vperm.xlu1 %1416, %v1717_v23   ;;  %320 = vperm.xlu0 %1415, %v1720_v24  }
  0x49   : > { %335 = vperm.xlu1 %1416, %v1725_v25   ;;  %330 = vperm.xlu0 %1415, %v1728_v26  }
  0x4d   : > { %345 = vperm.xlu1 %1416, %v1733_v27   ;;  %340 = vperm.xlu0 %1415, %v1736_v28  }
  0x51   : > { %355 = vperm.xlu1 %1416, %v1741_v29   ;;  %350 = vperm.xlu0 %1415, %v1744_v30  }
  0x55   : > { %365 = vperm.xlu1 %1416, %v1749_v31   ;;  %360 = vperm.xlu0 %1415, %v1752_v32  }
  0x59   : > { %1418 = vset.pattern.permute.xlu1 %v1550_v33  ;;  %1417 = vset.pattern.permute.xlu0 %v1550_v33 }
  0x5a   : > { %541 = vperm.xlu1 %1418, %v1640_v4   ;;  %537 = vperm.xlu0 %1417, %v1632_v2  }
  0x5e   : > { %545 = vperm.xlu1 %1418, %v1629_v1   ;;  %549 = vperm.xlu0 %1417, %v1637_v3  }
  0x62   : > { %553 = vperm.xlu1 %1418, %v1648_v6   ;;  %557 = vperm.xlu0 %1417, %v1645_v5  }
  0x66   : > { %561 = vperm.xlu1 %1418, %v1656_v8   ;;  %565 = vperm.xlu0 %1417, %v1653_v7  }
  0x6a   : > { %569 = vperm.xlu1 %1418, %v1664_v10   ;;  %573 = vperm.xlu0 %1417, %v1661_v9  }
  0x6e   : > { %577 = vperm.xlu1 %1418, %v1672_v12   ;;  %581 = vperm.xlu0 %1417, %v1669_v11  }
  0x72   : > { %585 = vperm.xlu1 %1418, %v1680_v14   ;;  %589 = vperm.xlu0 %1417, %v1677_v13  }
  0x76   : > { %593 = vperm.xlu1 %1418, %v1688_v16   ;;  %597 = vperm.xlu0 %1417, %v1685_v15  }
  0x7a   : > { %601 = vperm.xlu1 %1418, %v1696_v18   ;;  %605 = vperm.xlu0 %1417, %v1693_v17  }
  0x7e   : > { %609 = vperm.xlu1 %1418, %v1704_v20   ;;  %613 = vperm.xlu0 %1417, %v1701_v19  }
  0x82   : > { %617 = vperm.xlu1 %1418, %v1712_v22   ;;  %621 = vperm.xlu0 %1417, %v1709_v21  }
  0x86   : > { %625 = vperm.xlu1 %1418, %v1720_v24   ;;  %629 = vperm.xlu0 %1417, %v1717_v23  }
  0x8a   : > { %633 = vperm.xlu1 %1418, %v1728_v26   ;;  %637 = vperm.xlu0 %1417, %v1725_v25  }
  0x8e   : > { %641 = vperm.xlu1 %1418, %v1736_v28   ;;  %645 = vperm.xlu0 %1417, %v1733_v27  }
  0x92   : > { %649 = vperm.xlu1 %1418, %v1744_v30   ;;  %653 = vperm.xlu0 %1417, %v1741_v29  }
  0x96   : > { %657 = vperm.xlu1 %1418, %v1752_v32   ;;  %661 = vperm.xlu0 %1417, %v1749_v31  }
  0x98   : > { %v221_v35 = vpop.permute.xlu1 %220  ;;  %v211_v36 = vpop.permute.xlu0 %210 }
  0x99   : > { %v378_v37 = vsub.f32 %v221_v35, %v1795_v34  ;;  %v376_v38 = vsub.f32 %v211_v36, %v1795_v34 }
  0x9a   : > { %1419 = vset.pattern.permute.xlu1 %v1551_v39  ;;  %1420 = vset.pattern.permute.xlu0 %v1551_v39 }
  0x9b   : > { %961 = vperm.xlu1 %1419, %v1632_v2   ;;  %965 = vperm.xlu0 %1420, %v1640_v4   ;;  %v410_v0 = vmul.f32 2.5, %v378_v37 }
  0x9c   : > { %v226_v40 = vpop.permute.xlu1 %225  ;;  %v216_v41 = vpop.permute.xlu0 %215 }
  0x9d   : > { %v379_v42 = vsub.f32 %v226_v40, %v1795_v34  ;;  %v377_v43 = vsub.f32 %v216_v41, %v1795_v34  ;;  %1421 = vtanh.f32 %v410_v0 }
  0x9f   : > { %969 = vperm.xlu1 %1419, %v1629_v1   ;;  %977 = vperm.xlu0 %1420, %v1648_v6   ;;  %v408_v1 = vmul.f32 2.5, %v376_v38  ;;  %v411_v2 = vmul.f32 2.5, %v379_v42 }
  0xa0   : > { %v236_v44 = vpop.permute.xlu1 %235  ;;  %v231_v45 = vpop.permute.xlu0 %230 }
  0xa1   : > { %v381_v46 = vsub.f32 %v236_v44, %v1795_v34  ;;  %v380_v47 = vsub.f32 %v231_v45, %v1795_v34  ;;  %1423 = vtanh.f32 %v408_v1 }
  0xa2   : > { %1425 = vtanh.f32 %v411_v2 }
  0xa3   : > { %973 = vperm.xlu1 %1419, %v1637_v3   ;;  %985 = vperm.xlu0 %1420, %v1656_v8   ;;  %v413_v8 = vmul.f32 2.5, %v381_v46 }
  0xa4   : > { %v246_v48 = vpop.permute.xlu1 %245  ;;  %v241_v49 = vpop.permute.xlu0 %240 }
  0xa5   : > { %v383_v50 = vsub.f32 %v246_v48, %v1795_v34  ;;  %v382_v51 = vsub.f32 %v241_v49, %v1795_v34 }
  0xa7   : > { %981 = vperm.xlu1 %1419, %v1645_v5   ;;  %993 = vperm.xlu0 %1420, %v1664_v10   ;;  %v409_v5 = vmul.f32 2.5, %v377_v43  ;;  %v412_v10 = vmul.f32 2.5, %v380_v47 }
  0xa8   : > { %v256_v52 = vpop.permute.xlu1 %255  ;;  %v251_v53 = vpop.permute.xlu0 %250 }
  0xa9   : > { %v385_v54 = vsub.f32 %v256_v52, %v1795_v34  ;;  %v384_v55 = vsub.f32 %v251_v53, %v1795_v34  ;;  %1427 = vtanh.f32 %v409_v5 }
  0xaa   : > { %1429 = vtanh.f32 %v413_v8 }
  0xab   : > { %989 = vperm.xlu1 %1419, %v1653_v7   ;;  %1001 = vperm.xlu0 %1420, %v1672_v12   ;;  %v417_v35 = vmul.f32 2.5, %v385_v54  ;;  %1431 = vtanh.f32 %v412_v10  ;;  %v416_v36 = vmul.f32 2.5, %v384_v55 }
  0xac   : > { %v266_v56 = vpop.permute.xlu1 %265  ;;  %v261_v57 = vpop.permute.xlu0 %260 }
  0xad   : > { %v387_v58 = vsub.f32 %v266_v56, %v1795_v34  ;;  %v386_v59 = vsub.f32 %v261_v57, %v1795_v34 }
  0xaf   : > { %997 = vperm.xlu1 %1419, %v1661_v9   ;;  %1009 = vperm.xlu0 %1420, %v1680_v14   ;;  %v1828_v9 = vld [vmem:[%s1790_s29 + $0x4] ss:$0 sm:$0xff]  ;;  %v418_v38 = vmul.f32 2.5, %v386_v59 }
  0xb0   : > { %v276_v60 = vpop.permute.xlu1 %275  ;;  %v271_v61 = vpop.permute.xlu0 %270 }
  0xb1   : > { %v389_v62 = vsub.f32 %v276_v60, %v1795_v34  ;;  %v388_v63 = vsub.f32 %v271_v61, %v1795_v34 }
  0xb3   : > { %1005 = vperm.xlu1 %1419, %v1669_v11   ;;  %1017 = vperm.xlu0 %1420, %v1688_v16   ;;  %v415_v11 = vmul.f32 2.5, %v383_v50  ;;  %v414_v16 = vmul.f32 2.5, %v382_v51  ;;  %v421_v41 = vmul.f32 2.5, %v389_v62  ;;  %v420_v42 = vmul.f32 2.5, %v388_v63 }
  0xb4   : > { %v286_v3 = vpop.permute.xlu1 %285  ;;  %v281_v4 = vpop.permute.xlu0 %280 }
  0xb5   : > { %v391_v6 = vsub.f32 %v286_v3, %v1795_v34  ;;  %v390_v7 = vsub.f32 %v281_v4, %v1795_v34  ;;  %1433 = vtanh.f32 %v415_v11 }
  0xb6   : > { %1435 = vtanh.f32 %v414_v16 }
  0xb7   : > { %1013 = vperm.xlu1 %1419, %v1677_v13   ;;  %1025 = vperm.xlu0 %1420, %v1696_v18   ;;  %v419_v13 = vmul.f32 2.5, %v387_v58  ;;  %1437 = vtanh.f32 %v417_v35  ;;  %v422_v46 = vmul.f32 2.5, %v390_v7 }
  0xb8   : > { %v296_v12 = vpop.permute.xlu1 %295  ;;  %v291_v14 = vpop.permute.xlu0 %290  ;;  %1439 = vtanh.f32 %v416_v36 }
  0xb9   : > { %v393_v33 = vsub.f32 %v296_v12, %v1828_v9  ;;  %v392_v34 = vsub.f32 %v291_v14, %v1828_v9  ;;  %1441 = vtanh.f32 %v419_v13 }
  0xba   : > { %1443 = vtanh.f32 %v418_v38 }
  0xbb   : > { %1021 = vperm.xlu1 %1419, %v1685_v15   ;;  %1033 = vperm.xlu0 %1420, %v1704_v20   ;;  %v1422_v15 = vpop.eup %1421  ;;  %v423_v20 = vmul.f32 2.5, %v391_v6  ;;  %1445 = vtanh.f32 %v421_v41  ;;  %v425_v50 = vmul.f32 2.5, %v393_v33 }
  0xbc   : > { %v306_v18 = vpop.permute.xlu1 %305  ;;  %v301_v37 = vpop.permute.xlu0 %300  ;;  %1447 = vtanh.f32 %v420_v42  ;;  %v474_v4 = vadd.f32 1.0, %v1422_v15 }
  0xbd   : > { %v395_v39 = vsub.f32 %v306_v18, %v1828_v9  ;;  %v394_v40 = vsub.f32 %v301_v37, %v1828_v9  ;;  %v1424_v45 = vpop.eup %1423  ;;  %1449 = vtanh.f32 %v423_v20 }
  0xbe   : > { %v1426_v49 = vpop.eup %1425  ;;  %1451 = vtanh.f32 %v422_v46  ;;  %v1863_v18 = vmul.f32 0.5, %v474_v4 }
  0xbf   : > { %1029 = vperm.xlu1 %1419, %v1693_v17   ;;  %1041 = vperm.xlu0 %1420, %v1712_v22   ;;  %v1428_v51 = vpop.eup %1427  ;;  %v424_v17 = vmul.f32 2.5, %v392_v34  ;;  %v427_v52 = vmul.f32 2.5, %v395_v39  ;;  %v426_v56 = vmul.f32 2.5, %v394_v40  ;;  %1453 = vtanh.f32 %v425_v50 }
  0xc0   : > { %v316_v43 = vpop.permute.xlu1 %315  ;;  %v311_v44 = vpop.permute.xlu0 %310  ;;  %v475_v6 = vadd.f32 1.0, %v1426_v49  ;;  %v473_v7 = vadd.f32 1.0, %v1428_v51 }
  0xc1   : > { %v397_v47 = vsub.f32 %v316_v43, %v1828_v9  ;;  %v396_v48 = vsub.f32 %v311_v44, %v1828_v9  ;;  %v1430_v22 = vpop.eup %1429  ;;  %1455 = vtanh.f32 %v424_v17 }
  0xc2   : > { %v1432_v55 = vpop.eup %1431  ;;  %1457 = vtanh.f32 %v427_v52  ;;  %v477_v8 = vadd.f32 1.0, %v1430_v22  ;;  %v1869_v40 = vmul.f32 0.5, %v475_v6  ;;  %v1871_v41 = vmul.f32 0.5, %v473_v7 }
  0xc3   : > { %1037 = vperm.xlu1 %1419, %v1701_v19   ;;  %1049 = vperm.xlu0 %1420, %v1720_v24   ;;  %v1434_v59 = vpop.eup %1433  ;;  %v429_v60 = vmul.f32 2.5, %v397_v47  ;;  %v428_v24 = vmul.f32 2.5, %v396_v48  ;;  %1459 = vtanh.f32 %v426_v56  ;;  %v476_v14 = vadd.f32 1.0, %v1432_v55 }
  0xc4   : > { %v326_v53 = vpop.permute.xlu1 %325  ;;  %v321_v54 = vpop.permute.xlu0 %320  ;;  %v1873_v42 = vmul.f32 0.5, %v477_v8 }
  0xc5   : > { %v399_v57 = vsub.f32 %v326_v53, %v1828_v9  ;;  %v398_v58 = vsub.f32 %v321_v54, %v1828_v9  ;;  %v1436_v61 = vpop.eup %1435  ;;  %1461 = vtanh.f32 %v429_v60 }
  0xc6   : > { %v1438_v19 = vpop.eup %1437  ;;  %1463 = vtanh.f32 %v428_v24  ;;  %v478_v36 = vadd.f32 1.0, %v1436_v61 }
  0xc7   : > { %1045 = vperm.xlu1 %1419, %v1709_v21   ;;  %1057 = vperm.xlu0 %1420, %v1728_v26   ;;  %v1440_v0 = vpop.eup %1439  ;;  %v472_v26 = vadd.f32 1.0, %v1424_v45  ;;  %v431_v16 = vmul.f32 2.5, %v399_v57  ;;  %v430_v15 = vmul.f32 2.5, %v398_v58  ;;  %v1879_v45 = vmul.f32 0.5, %v476_v14 }
  0xc8   : > { %v1848_v62 = vpop.permute.xlu1 %335  ;;  %v1850_v63 = vpop.permute.xlu0 %330  ;;  %v480_v38 = vadd.f32 1.0, %v1440_v0  ;;  %v1887_v48 = vmul.f32 0.5, %v478_v36  ;;  %v1552_v36 = vmov 0.0  }
  0xc9   : > { %v401_v1 = vsub.f32 %v1848_v62, %v1828_v9  ;;  %v400_v2 = vsub.f32 %v1850_v63, %v1828_v9  ;;  %v1442_v3 = vpop.eup %1441  ;;  %v1865_v37 = vmul.f32 0.5, %v472_v26  ;;  %1465 = vtanh.f32 %v431_v16 }
  0xca   : > { %v1444_v21 = vpop.eup %1443  ;;  %v483_v50 = vadd.f32 1.0, %v1442_v3  ;;  %v1891_v17 = vmul.f32 0.5, %v480_v38  ;;  %1467 = vtanh.f32 %v430_v15 }
  0xcb   : > { %1053 = vperm.xlu1 %1419, %v1717_v23   ;;  %1065 = vperm.xlu0 %1420, %v1736_v28   ;;  %v1446_v5 = vpop.eup %1445  ;;  %v479_v23 = vadd.f32 1.0, %v1434_v59  ;;  %v481_v28 = vadd.f32 1.0, %v1438_v19  ;;  %v482_v22 = vadd.f32 1.0, %v1444_v21  ;;  %v433_v61 = vmul.f32 2.5, %v401_v1 }
  0xcc   : > { %v346_v10 = vpop.permute.xlu1 %345  ;;  %v1858_v11 = vpop.permute.xlu0 %340  ;;  %v485_v52 = vadd.f32 1.0, %v1446_v5  ;;  %v432_v3 = vmul.f32 2.5, %v400_v2  ;;  %v1914_v5 = vld [vmem:[%s1790_s29 + $0x1] ss:$0 sm:$0xff] }
  0xcd   : > { %v1448_v12 = vpop.eup %1447  ;;  %v403_v33 = vsub.f32 %v346_v10, %v1828_v9  ;;  %v402_v34 = vsub.f32 %v1858_v11, %v1828_v9  ;;  %v1885_v47 = vmul.f32 0.5, %v479_v23  ;;  %v1889_v49 = vmul.f32 0.5, %v481_v28 }
  0xce   : > { %v1450_v35 = vpop.eup %1449  ;;  %v484_v53 = vadd.f32 1.0, %v1448_v12  ;;  %v1908_v21 = vmul.f32 0.5, %v482_v22  ;;  %v1910_v4 = vmul.f32 0.5, %v485_v52  ;;  %1469 = vtanh.f32 %v433_v61 }
  0xcf   : > { %v1452_v13 = vpop.eup %1451  ;;  %1061 = vperm.xlu1 %1419, %v1725_v25   ;;  %1073 = vperm.xlu0 %1420, %v1744_v30   ;;  %v487_v55 = vadd.f32 1.0, %v1450_v35  ;;  %v435_v26 = vmul.f32 2.5, %v403_v33  ;;  %v434_v12 = vmul.f32 2.5, %v402_v34  ;;  %1471 = vtanh.f32 %v432_v3 }
  0xd0   : > { %v1454_v39 = vpop.eup %1453  ;;  %v1875_v20 = vpop.permute.xlu1 %355  ;;  %v486_v56 = vadd.f32 1.0, %v1452_v13  ;;  %v1916_v6 = vmul.f32 0.5, %v484_v53 }
  0xd1   : > { %v1877_v43 = vpop.permute.xlu0 %350  ;;  %v1456_v44 = vpop.eup %1455  ;;  %v405_v25 = vsub.f32 %v1875_v20, %v1828_v9  ;;  %v489_v57 = vadd.f32 1.0, %v1454_v39  ;;  %v1918_v7 = vmul.f32 0.5, %v487_v55  ;;  %1473 = vtanh.f32 %v435_v26 }
  0xd2   : > { %v404_v30 = vsub.f32 %v1877_v43, %v1828_v9  ;;  %v1458_v46 = vpop.eup %1457  ;;  %v488_v60 = vadd.f32 1.0, %v1456_v44  ;;  %v1920_v8 = vmul.f32 0.5, %v486_v56  ;;  %1475 = vtanh.f32 %v434_v12 }
  0xd3   : > { %v1460_v51 = vpop.eup %1459  ;;  %1069 = vperm.xlu1 %1419, %v1733_v27   ;;  %1081 = vperm.xlu0 %1420, %v1752_v32   ;;  %v1903_v32 = vmul.f32 0.5, %v483_v50  ;;  %v491_v62 = vadd.f32 1.0, %v1458_v46  ;;  %v1922_v10 = vmul.f32 0.5, %v489_v57  ;;  %v437_v38 = vmul.f32 2.5, %v405_v25 }
  0xd4   : > { %v1462_v54 = vpop.eup %1461  ;;  %v1895_v58 = vpop.permute.xlu1 %365  ;;  %v490_v0 = vadd.f32 1.0, %v1460_v51  ;;  %v1924_v63 = vmul.f32 0.5, %v488_v60 }
  0xd5   : > { %v1897_v59 = vpop.permute.xlu0 %360  ;;  %v407_v19 = vsub.f32 %v1895_v58, %v1828_v9  ;;  %v1464_v24 = vpop.eup %1463  ;;  %v493_v1 = vadd.f32 1.0, %v1462_v54  ;;  %v1929_v16 = vmul.f32 0.5, %v491_v62  ;;  %1477 = vtanh.f32 %v437_v38 }
  0xd6   : > { %v406_v27 = vsub.f32 %v1897_v59, %v1828_v9  ;;  %v492_v2 = vadd.f32 1.0, %v1464_v24  ;;  %v1931_v33 = vmul.f32 0.5, %v490_v0  ;;  %v1466_v35 = vpop.eup %1465 }
  0xd7   : > { %1077 = vperm.xlu1 %1419, %v1741_v29   ;;  %v1934_v23 = vmul.f32 0.5, %v493_v1  ;;  %v1468_v44 = vpop.eup %1467  ;;  %v495_v46 = vadd.f32 1.0, %v1466_v35  ;;  %v439_v35 = vmul.f32 2.5, %v407_v19 }
  0xd8   : > { %v1943_v13 = vmul.f32 0.5, %v492_v2  ;;  %v494_v53 = vadd.f32 1.0, %v1468_v44  ;;  %v1470_v61 = vpop.eup %1469 }
  0xd9   : > { %v542_v14 = vpop.permute.xlu1 %541  ;;  %v538_v29 = vpop.permute.xlu0 %537  ;;  %v1964_v56 = vmul.f32 0.5, %v495_v46 }
  0xda   : > { %vm673_vm0 = vcmp.gt.f32.partialorder %v542_v14, %v1914_v5  ;;  %vm672_vm1 = vcmp.gt.f32.partialorder %v538_v29, %v1914_v5  ;;  %vm769_vm2 = vcmp.ne.f32.partialorder %v542_v14, %v1914_v5  ;;  %vm768_vm3 = vcmp.ne.f32.partialorder %v538_v29, %v1914_v5  ;;  %v1472_v62 = vpop.eup %1471 }
  0xdb   : > { %v1296_v28 = vsel %vm673_vm0, 1.0, %v1552_v36  ;;  %1085 = vperm.xlu1 %1419, %v1749_v31   ;;  %v1295_v34 = vsel %vm672_vm1, 1.0, %v1552_v36  ;;  %v1327_v31 = vsel %vm768_vm3, 1.0, %v1552_v36  ;;  %v1328_v51 = vsel %vm769_vm2, 1.0, %v1552_v36  ;;  %v1975_v26 = vpop.eup %1473 }
  0xdc   : > { %v865_v11 = vsub.f32 %v1871_v41, %v1296_v28  ;;  %v864_v39 = vsub.f32 %v1865_v37, %v1295_v34  ;;  %v436_v41 = vmul.f32 2.5, %v404_v30  ;;  %v1988_v34 = vpop.eup %1475 }
  0xdd   : > { %v546_v15 = vpop.permute.xlu1 %545  ;;  %v550_v20 = vpop.permute.xlu0 %549 }
  0xde   : > { %v897_v50 = vmul.f32 %v865_v11, %v865_v11  ;;  %vm674_vm4 = vcmp.gt.f32.partialorder %v546_v15, %v1914_v5  ;;  %v896_v25 = vmul.f32 %v864_v39, %v864_v39  ;;  %vm770_vm5 = vcmp.ne.f32.partialorder %v546_v15, %v1914_v5 }
  0xdf   : > { %v1297_v37 = vsel %vm674_vm4, 1.0, %v1552_v36  ;;  %vm675_vm6 = vcmp.gt.f32.partialorder %v550_v20, %v1914_v5  ;;  %vm771_vm7 = vcmp.ne.f32.partialorder %v550_v20, %v1914_v5  ;;  %1479 = vtanh.f32 %v436_v41 }
  0xe0   : > { %v1955_v22 = vmul.f32 %v1328_v51, %v897_v50  ;;  %v866_v52 = vsub.f32 %v1863_v18, %v1297_v37  ;;  %v1960_v54 = vmul.f32 %v1327_v31, %v896_v25  ;;  %v1298_v43 = vsel %vm675_vm6, 1.0, %v1552_v36 }
  0xe1   : > { %v554_v30 = vpop.permute.xlu1 %553  ;;  %v558_v55 = vpop.permute.xlu0 %557  ;;  %v867_v60 = vsub.f32 %v1869_v40, %v1298_v43  ;;  %v1329_v18 = vsel %vm770_vm5, 1.0, %v1552_v36  ;;  %v1330_v24 = vsel %vm771_vm7, 1.0, %v1552_v36  ;;  %v1977_v40 = vmul.f32 0.5, %v494_v53 }
  0xe2   : > { %v898_v57 = vmul.f32 %v866_v52, %v866_v52  ;;  %vm676_vm8 = vcmp.gt.f32.partialorder %v554_v30, %v1914_v5  ;;  %vm677_vm9 = vcmp.gt.f32.partialorder %v558_v55, %v1914_v5  ;;  %vm772_vm10 = vcmp.ne.f32.partialorder %v554_v30, %v1914_v5 }
  0xe3   : > { %v899_v3 = vmul.f32 %v867_v60, %v867_v60  ;;  %v1299_v1 = vsel %vm676_vm8, 1.0, %v1552_v36  ;;  %v1300_v12 = vsel %vm677_vm9, 1.0, %v1552_v36  ;;  %vm773_vm11 = vcmp.ne.f32.partialorder %v558_v55, %v1914_v5 }
  0xe4   : > { %v1971_v0 = vmul.f32 %v1329_v18, %v898_v57  ;;  %v868_v2 = vsub.f32 %v1879_v45, %v1299_v1  ;;  %v869_v11 = vsub.f32 %v1873_v42, %v1300_v12  ;;  %v1993_v45 = vmul.f32 2.5, %v406_v27 }
  0xe5   : > { %v562_v14 = vpop.permute.xlu1 %561  ;;  %v566_v29 = vpop.permute.xlu0 %565  ;;  %v1984_v28 = vmul.f32 %v1330_v24, %v899_v3  ;;  %v1331_v38 = vsel %vm772_vm10, 1.0, %v1552_v36  ;;  %v1332_v15 = vsel %vm773_vm11, 1.0, %v1552_v36  ;;  %v2010_v50 = vadd.f32 1.0, %v1470_v61 }
  0xe6   : > { %v900_v39 = vmul.f32 %v868_v2, %v868_v2  ;;  %vm678_vm12 = vcmp.gt.f32.partialorder %v562_v14, %v1914_v5  ;;  %v901_v58 = vmul.f32 %v869_v11, %v869_v11  ;;  %vm774_vm13 = vcmp.ne.f32.partialorder %v562_v14, %v1914_v5 }
  0xe7   : > { %v1301_v19 = vsel %vm678_vm12, 1.0, %v1552_v36  ;;  %vm679_vm14 = vcmp.gt.f32.partialorder %v566_v29, %v1914_v5  ;;  %vm775_vm15 = vcmp.ne.f32.partialorder %v566_v29, %v1914_v5  ;;  %v1333_v31 = vsel %vm774_vm13, 1.0, %v1552_v36 }
  0xe8   : > { %v2000_v42 = vmul.f32 %v1331_v38, %v900_v39  ;;  %v870_v9 = vsub.f32 %v1887_v48, %v1301_v19  ;;  %v1302_v59 = vsel %vm679_vm14, 1.0, %v1552_v36  ;;  %v2005_v44 = vmul.f32 %v1332_v15, %v901_v58  ;;  %v2014_v48 = vpop.eup %1477 }
  0xe9   : > { %v570_v27 = vpop.permute.xlu1 %569  ;;  %v574_v20 = vpop.permute.xlu0 %573  ;;  %v871_v46 = vsub.f32 %v1885_v47, %v1302_v59  ;;  %v1334_v47 = vsel %vm775_vm15, 1.0, %v1552_v36  ;;  %v2024_v55 = vadd.f32 1.0, %v1472_v62  ;;  %1481 = vtanh.f32 %v439_v35 }
  0xea   : > { %vm680_vm0 = vcmp.gt.f32.partialorder %v570_v27, %v1914_v5  ;;  %v902_v41 = vmul.f32 %v870_v9, %v870_v9  ;;  %vm776_vm1 = vcmp.ne.f32.partialorder %v570_v27, %v1914_v5  ;;  %vm681_vm2 = vcmp.gt.f32.partialorder %v574_v20, %v1914_v5 }
  0xeb   : > { %v1303_v51 = vsel %vm680_vm0, 1.0, %v1552_v36  ;;  %v903_v25 = vmul.f32 %v871_v46, %v871_v46  ;;  %v1304_v53 = vsel %vm681_vm2, 1.0, %v1552_v36  ;;  %vm777_vm3 = vcmp.ne.f32.partialorder %v574_v20, %v1914_v5 }
  0xec   : > { %v872_v37 = vsub.f32 %v1891_v17, %v1303_v51  ;;  %v2019_v52 = vmul.f32 %v1333_v31, %v902_v41  ;;  %v873_v61 = vsub.f32 %v1889_v49, %v1304_v53  ;;  %v2029_v17 = vpop.eup %1479  ;;  %v1335_v18 = vsel %vm776_vm1, 1.0, %v1552_v36 }
  0xed   : > { %v578_v43 = vpop.permute.xlu1 %577  ;;  %v582_v30 = vpop.permute.xlu0 %581  ;;  %v2026_v57 = vmul.f32 %v1334_v47, %v903_v25  ;;  %v1336_v49 = vsel %vm777_vm3, 1.0, %v1552_v36  ;;  %v2070_v25 = vld [vmem:[%s1790_s29 + $0x5] ss:$0 sm:$0xff]  ;;  %v2078_v53 = vmul.f32 0.5, %v2010_v50  ;;  %1483 = vtanh.f32 %v1993_v45 }
  0xee   : > { %v904_v60 = vmul.f32 %v872_v37, %v872_v37  ;;  %vm682_vm4 = vcmp.gt.f32.partialorder %v578_v43, %v1914_v5  ;;  %vm683_vm5 = vcmp.gt.f32.partialorder %v582_v30, %v1914_v5  ;;  %vm779_vm6 = vcmp.ne.f32.partialorder %v582_v30, %v1914_v5 }
  0xef   : > { %v905_v3 = vmul.f32 %v873_v61, %v873_v61  ;;  %v1305_v62 = vsel %vm682_vm4, 1.0, %v1552_v36  ;;  %vm778_vm7 = vcmp.ne.f32.partialorder %v578_v43, %v1914_v5  ;;  %v1306_v2 = vsel %vm683_vm5, 1.0, %v1552_v36 }
  0xf0   : > { %v2035_v24 = vmul.f32 %v1335_v18, %v904_v60  ;;  %v874_v1 = vsub.f32 %v1908_v21, %v1305_v62  ;;  %v875_v11 = vsub.f32 %v1903_v32, %v1306_v2  ;;  %v1337_v35 = vsel %vm778_vm7, 1.0, %v1552_v36 }
  0xf1   : > { %v586_v12 = vpop.permute.xlu1 %585  ;;  %v590_v14 = vpop.permute.xlu0 %589  ;;  %v2044_v29 = vmul.f32 %v1336_v49, %v905_v3  ;;  %v1338_v15 = vsel %vm779_vm6, 1.0, %v1552_v36 }
  0xf2   : > { %vm684_vm8 = vcmp.gt.f32.partialorder %v586_v12, %v1914_v5  ;;  %vm780_vm9 = vcmp.ne.f32.partialorder %v586_v12, %v1914_v5  ;;  %v906_v38 = vmul.f32 %v874_v1, %v874_v1  ;;  %vm685_vm10 = vcmp.gt.f32.partialorder %v590_v14, %v1914_v5 }
  0xf3   : > { %v1307_v39 = vsel %vm684_vm8, 1.0, %v1552_v36  ;;  %v907_v21 = vmul.f32 %v875_v11, %v875_v11  ;;  %v1308_v19 = vsel %vm685_vm10, 1.0, %v1552_v36  ;;  %vm781_vm11 = vcmp.ne.f32.partialorder %v590_v14, %v1914_v5 }
  0xf4   : > { %v876_v58 = vsub.f32 %v1916_v6, %v1307_v39  ;;  %v2055_v32 = vmul.f32 %v1337_v35, %v906_v38  ;;  %v1339_v9 = vsel %vm780_vm9, 1.0, %v1552_v36  ;;  %v877_v59 = vsub.f32 %v1910_v4, %v1308_v19 }
  0xf5   : > { %v594_v27 = vpop.permute.xlu1 %593  ;;  %v598_v20 = vpop.permute.xlu0 %597  ;;  %v2062_v46 = vmul.f32 %v1338_v15, %v907_v21  ;;  %v1340_v31 = vsel %vm781_vm11, 1.0, %v1552_v36  ;;  %v2098_v12 = vmul.f32 0.5, %v2024_v55  ;;  %v499_v15 = vadd.f32 1.0, %v1975_v26 }
  0xf6   : > { %v908_v6 = vmul.f32 %v876_v58, %v876_v58  ;;  %vm686_vm12 = vcmp.gt.f32.partialorder %v594_v27, %v1914_v5  ;;  %vm782_vm13 = vcmp.ne.f32.partialorder %v594_v27, %v1914_v5  ;;  %v909_v41 = vmul.f32 %v877_v59, %v877_v59 }
  0xf7   : > { %v1309_v51 = vsel %vm686_vm12, 1.0, %v1552_v36  ;;  %vm687_vm14 = vcmp.gt.f32.partialorder %v598_v20, %v1914_v5  ;;  %vm783_vm15 = vcmp.ne.f32.partialorder %v598_v20, %v1914_v5  ;;  %v1341_v30 = vsel %vm782_vm13, 1.0, %v1552_v36 }
  0xf8   : > { %v2072_v37 = vmul.f32 %v1339_v9, %v908_v6  ;;  %v878_v4 = vsub.f32 %v1920_v8, %v1309_v51  ;;  %v1310_v47 = vsel %vm687_vm14, 1.0, %v1552_v36  ;;  %v2080_v43 = vmul.f32 %v1340_v31, %v909_v41  ;;  %v2087_v8 = vpop.eup %1481 }
  0xf9   : > { %v879_v60 = vsub.f32 %v1918_v7, %v1310_v47  ;;  %v602_v61 = vpop.permute.xlu1 %601  ;;  %v606_v18 = vpop.permute.xlu0 %605  ;;  %v1342_v5 = vsel %vm783_vm15, 1.0, %v1552_v36  ;;  %v498_v9 = vadd.f32 1.0, %v1988_v34  ;;  %v531_v47 = vmul.f32 0.5, %v499_v15 }
  0xfa   : > { %v910_v3 = vmul.f32 %v878_v4, %v878_v4  ;;  %vm688_vm0 = vcmp.gt.f32.partialorder %v602_v61, %v2070_v25  ;;  %vm784_vm1 = vcmp.ne.f32.partialorder %v602_v61, %v2070_v25  ;;  %vm689_vm2 = vcmp.gt.f32.partialorder %v606_v18, %v2070_v25 }
  0xfb   : > { %v911_v50 = vmul.f32 %v879_v60, %v879_v60  ;;  %v1311_v62 = vsel %vm688_vm0, 1.0, %v1552_v36  ;;  %v1312_v49 = vsel %vm689_vm2, 1.0, %v1552_v36  ;;  %vm785_vm3 = vcmp.ne.f32.partialorder %v606_v18, %v2070_v25 }
  0xfc   : > { %v2092_v1 = vmul.f32 %v1341_v30, %v910_v3  ;;  %v880_v7 = vsub.f32 %v1924_v63, %v1311_v62  ;;  %v881_v2 = vsub.f32 %v1922_v10, %v1312_v49  ;;  %v1343_v11 = vsel %vm784_vm1, 1.0, %v1552_v36  ;;  %v1484_v62 = vpop.eup %1483 }
  0xfd   : > { %v2101_v14 = vmul.f32 %v1342_v5, %v911_v50  ;;  %v610_v35 = vpop.permute.xlu1 %609  ;;  %v614_v38 = vpop.permute.xlu0 %613  ;;  %v1344_v63 = vsel %vm785_vm3, 1.0, %v1552_v36  ;;  %v530_v30 = vmul.f32 0.5, %v498_v9 }
  0xfe   : > { %v912_v39 = vmul.f32 %v880_v7, %v880_v7  ;;  %v913_v21 = vmul.f32 %v881_v2, %v881_v2  ;;  %vm690_vm4 = vcmp.gt.f32.partialorder %v610_v35, %v2070_v25  ;;  %vm786_vm5 = vcmp.ne.f32.partialorder %v610_v35, %v2070_v25 }
  0xff   : > { %v1313_v10 = vsel %vm690_vm4, 1.0, %v1552_v36  ;;  %vm691_vm6 = vcmp.gt.f32.partialorder %v614_v38, %v2070_v25  ;;  %vm787_vm7 = vcmp.ne.f32.partialorder %v614_v38, %v2070_v25  ;;  %v1345_v59 = vsel %vm786_vm5, 1.0, %v1552_v36 }
 0x100   : > { %v2110_v45 = vmul.f32 %v1343_v11, %v912_v39  ;;  %v2112_v55 = vmul.f32 %v1344_v63, %v913_v21  ;;  %v882_v58 = vsub.f32 %v1931_v33, %v1313_v10  ;;  %v1314_v19 = vsel %vm691_vm6, 1.0, %v1552_v36 }
 0x101   : > { %v883_v27 = vsub.f32 %v1929_v16, %v1314_v19  ;;  %v618_v20 = vpop.permute.xlu1 %617  ;;  %v622_v6 = vpop.permute.xlu0 %621  ;;  %v1346_v33 = vsel %vm787_vm7, 1.0, %v1552_v36  ;;  %v501_v35 = vadd.f32 1.0, %v2014_v48  ;;  %v500_v38 = vadd.f32 1.0, %v2029_v17 }
 0x102   : > { %v914_v31 = vmul.f32 %v882_v58, %v882_v58  ;;  %vm692_vm8 = vcmp.gt.f32.partialorder %v618_v20, %v2070_v25  ;;  %vm788_vm9 = vcmp.ne.f32.partialorder %v618_v20, %v2070_v25  ;;  %vm693_vm10 = vcmp.gt.f32.partialorder %v622_v6, %v2070_v25 }
 0x103   : > { %v915_v41 = vmul.f32 %v883_v27, %v883_v27  ;;  %v1315_v26 = vsel %vm692_vm8, 1.0, %v1552_v36  ;;  %v1316_v34 = vsel %vm693_vm10, 1.0, %v1552_v36  ;;  %vm789_vm11 = vcmp.ne.f32.partialorder %v622_v6, %v2070_v25 }
 0x104   : > { %v2126_v51 = vmul.f32 %v1345_v59, %v914_v31  ;;  %v884_v16 = vsub.f32 %v1943_v13, %v1315_v26  ;;  %v885_v4 = vsub.f32 %v1934_v23, %v1316_v34  ;;  %v1347_v61 = vsel %vm788_vm9, 1.0, %v1552_v36 }
 0x105   : > { %v2131_v60 = vmul.f32 %v1346_v33, %v915_v41  ;;  %v626_v18 = vpop.permute.xlu1 %625  ;;  %v630_v3 = vpop.permute.xlu0 %629  ;;  %v1348_v13 = vsel %vm789_vm11, 1.0, %v1552_v36  ;;  %v533_v59 = vmul.f32 0.5, %v501_v35  ;;  %v532_v27 = vmul.f32 0.5, %v500_v38 }
 0x106   : > { %v916_v5 = vmul.f32 %v884_v16, %v884_v16  ;;  %v917_v50 = vmul.f32 %v885_v4, %v885_v4  ;;  %vm694_vm12 = vcmp.gt.f32.partialorder %v626_v18, %v2070_v25  ;;  %vm790_vm13 = vcmp.ne.f32.partialorder %v626_v18, %v2070_v25 }
 0x107   : > { %v1317_v49 = vsel %vm694_vm12, 1.0, %v1552_v36  ;;  %vm695_vm14 = vcmp.gt.f32.partialorder %v630_v3, %v2070_v25  ;;  %vm791_vm15 = vcmp.ne.f32.partialorder %v630_v3, %v2070_v25  ;;  %v1349_v39 = vsel %vm790_vm13, 1.0, %v1552_v36 }
 0x108   : > { %v2140_v23 = vmul.f32 %v1347_v61, %v916_v5  ;;  %v2142_v7 = vmul.f32 %v1348_v13, %v917_v50  ;;  %v886_v2 = vsub.f32 %v1977_v40, %v1317_v49  ;;  %v1318_v11 = vsel %vm695_vm14, 1.0, %v1552_v36 }
 0x109   : > { %v887_v21 = vsub.f32 %v1964_v56, %v1318_v11  ;;  %v634_v63 = vpop.permute.xlu1 %633  ;;  %v638_v10 = vpop.permute.xlu0 %637  ;;  %v1350_v40 = vsel %vm791_vm15, 1.0, %v1552_v36  ;;  %v503_v18 = vadd.f32 1.0, %v2087_v8  ;;  %v502_v3 = vadd.f32 1.0, %v1484_v62 }
 0x10a   : > { %v918_v58 = vmul.f32 %v886_v2, %v886_v2  ;;  %vm696_vm0 = vcmp.gt.f32.partialorder %v634_v63, %v2070_v25  ;;  %vm792_vm1 = vcmp.ne.f32.partialorder %v634_v63, %v2070_v25  ;;  %vm697_vm2 = vcmp.gt.f32.partialorder %v638_v10, %v2070_v25 }
 0x10b   : > { %v919_v19 = vmul.f32 %v887_v21, %v887_v21  ;;  %v1319_v48 = vsel %vm696_vm0, 1.0, %v1552_v36  ;;  %v1320_v17 = vsel %vm697_vm2, 1.0, %v1552_v36  ;;  %vm793_vm3 = vcmp.ne.f32.partialorder %v638_v10, %v2070_v25 }
 0x10c   : > { %v2156_v15 = vmul.f32 %v1349_v39, %v918_v58  ;;  %v888_v56 = vsub.f32 %v2098_v12, %v1319_v48  ;;  %v889_v9 = vsub.f32 %v2078_v53, %v1320_v17  ;;  %v1351_v6 = vsel %vm792_vm1, 1.0, %v1552_v36 }
 0x10d   : > { %v2161_v20 = vmul.f32 %v1350_v40, %v919_v19  ;;  %v642_v31 = vpop.permute.xlu1 %641  ;;  %v646_v33 = vpop.permute.xlu0 %645  ;;  %v1352_v12 = vsel %vm793_vm3, 1.0, %v1552_v36  ;;  %v535_v39 = vmul.f32 0.5, %v503_v18  ;;  %v534_v21 = vmul.f32 0.5, %v502_v3 }
 0x10e   : > { %v920_v41 = vmul.f32 %v888_v56, %v888_v56  ;;  %v921_v26 = vmul.f32 %v889_v9, %v889_v9  ;;  %vm698_vm4 = vcmp.gt.f32.partialorder %v642_v31, %v2070_v25  ;;  %vm794_vm5 = vcmp.ne.f32.partialorder %v642_v31, %v2070_v25  ;;  %v2202_v31 = vld [vmem:[%s1790_s29 + $0x2] ss:$0 sm:$0xff] }
 0x10f   : > { %v1321_v34 = vsel %vm698_vm4, 1.0, %v1552_v36  ;;  %vm699_vm6 = vcmp.gt.f32.partialorder %v646_v33, %v2070_v25  ;;  %vm795_vm7 = vcmp.ne.f32.partialorder %v646_v33, %v2070_v25  ;;  %v1353_v5 = vsel %vm794_vm5, 1.0, %v1552_v36 }
 0x110   : > { %v2170_v53 = vmul.f32 %v1351_v6, %v920_v41  ;;  %v2172_v16 = vmul.f32 %v1352_v12, %v921_v26  ;;  %v890_v4 = vsub.f32 %v530_v30, %v1321_v34  ;;  %v1322_v61 = vsel %vm699_vm6, 1.0, %v1552_v36 }
 0x111   : > { %v891_v50 = vsub.f32 %v531_v47, %v1322_v61  ;;  %v650_v13 = vpop.permute.xlu1 %649  ;;  %v654_v49 = vpop.permute.xlu0 %653  ;;  %v1354_v11 = vsel %vm795_vm7, 1.0, %v1552_v36 }
 0x112   : > { %v922_v2 = vmul.f32 %v890_v4, %v890_v4  ;;  %vm700_vm8 = vcmp.gt.f32.partialorder %v650_v13, %v2070_v25  ;;  %vm701_vm9 = vcmp.gt.f32.partialorder %v654_v49, %v2070_v25  ;;  %vm796_vm10 = vcmp.ne.f32.partialorder %v650_v13, %v2070_v25 }
 0x113   : > { %v923_v35 = vmul.f32 %v891_v50, %v891_v50  ;;  %v1323_v30 = vsel %vm700_vm8, 1.0, %v1552_v36  ;;  %v1324_v8 = vsel %vm701_vm9, 1.0, %v1552_v36  ;;  %vm797_vm11 = vcmp.ne.f32.partialorder %v654_v49, %v2070_v25 }
 0x114   : > { %v2183_v62 = vmul.f32 %v1353_v5, %v922_v2  ;;  %v892_v47 = vsub.f32 %v532_v27, %v1323_v30  ;;  %v893_v38 = vsub.f32 %v533_v59, %v1324_v8  ;;  %v1356_v10 = vsel %vm797_vm11, 1.0, %v1552_v36 }
 0x115   : > { %v2186_v63 = vmul.f32 %v1354_v11, %v923_v35  ;;  %v658_v58 = vpop.permute.xlu1 %657  ;;  %v662_v40 = vpop.permute.xlu0 %661  ;;  %v1355_v19 = vsel %vm796_vm10, 1.0, %v1552_v36 }
 0x116   : > { %v924_v48 = vmul.f32 %v892_v47, %v892_v47  ;;  %v925_v17 = vmul.f32 %v893_v38, %v893_v38  ;;  %vm702_vm12 = vcmp.gt.f32.partialorder %v658_v58, %v2070_v25  ;;  %vm798_vm13 = vcmp.ne.f32.partialorder %v658_v58, %v2070_v25 }
 0x117   : > { %v1325_v56 = vsel %vm702_vm12, 1.0, %v1552_v36  ;;  %vm703_vm14 = vcmp.gt.f32.partialorder %v662_v40, %v2070_v25  ;;  %vm799_vm15 = vcmp.ne.f32.partialorder %v662_v40, %v2070_v25  ;;  %v1357_v4 = vsel %vm798_vm13, 1.0, %v1552_v36 }
 0x118   : > { %v2196_v9 = vmul.f32 %v1355_v19, %v924_v48  ;;  %v2198_v59 = vmul.f32 %v1356_v10, %v925_v17  ;;  %v894_v27 = vsub.f32 %v534_v21, %v1325_v56  ;;  %v1326_v6 = vsel %vm703_vm14, 1.0, %v1552_v36 }
 0x119   : > { %v1358_v33 = vsel %vm799_vm15, 1.0, %v1552_v36  ;;  %v895_v41 = vsub.f32 %v535_v39, %v1326_v6 }
 0x11a   : > { %v926_v26 = vmul.f32 %v894_v27, %v894_v27  ;;  %v962_v12 = vpop.permute.xlu1 %961  ;;  %v966_v34 = vpop.permute.xlu0 %965 }
 0x11b   : > { %v927_v25 = vmul.f32 %v895_v41, %v895_v41  ;;  %v1096_v61 = vmul.f32 %v2202_v31, %v962_v12  ;;  %v1097_v18 = vmul.f32 %v2202_v31, %v966_v34  ;;  %v2253_v34 = vld [vmem:[%s1790_s29 + $0x6] ss:$0 sm:$0xff] }
 0x11c   : > { %v2210_v3 = vmul.f32 %v1357_v4, %v926_v26 }
 0x11d   : > { %v2212_v5 = vmul.f32 %v1358_v33, %v927_v25  ;;  %v1128_v50 = vmul.f32 %v1096_v61, %v1960_v54  ;;  %v1129_v13 = vmul.f32 %v1097_v18, %v1955_v22 }
 0x11e   : > { %v970_v49 = vpop.permute.xlu1 %969  ;;  %v978_v2 = vpop.permute.xlu0 %977 }
 0x11f   : > { %1160 = vst [vmem:[%s2216_s4] sm:$0xff] %v1128_v50  ;;  %1161 = vst [vmem:[%s2216_s4 + $0x8] sm:$0xff] %v1129_v13  ;;  %v1098_v36 = vmul.f32 %v2202_v31, %v970_v49  ;;  %v1100_v11 = vmul.f32 %v2202_v31, %v978_v2 }
 0x121   : > { %v1130_v54 = vmul.f32 %v1098_v36, %v1971_v0  ;;  %v1132_v22 = vmul.f32 %v1100_v11, %v2000_v42 }
 0x122   : > { %v974_v35 = vpop.permute.xlu1 %973  ;;  %v986_v30 = vpop.permute.xlu0 %985 }
 0x123   : > { %1162 = vst [vmem:[%s2216_s4 + $0x10] sm:$0xff] %v1130_v54  ;;  %1164 = vst [vmem:[%s2216_s4 + $0x20] sm:$0xff] %v1132_v22  ;;  %v1099_v8 = vmul.f32 %v2202_v31, %v974_v35  ;;  %v1102_v47 = vmul.f32 %v2202_v31, %v986_v30 }
 0x125   : > { %v1131_v38 = vmul.f32 %v1099_v8, %v1984_v28  ;;  %v1134_v39 = vmul.f32 %v1102_v47, %v2019_v52 }
 0x126   : > { %v982_v21 = vpop.permute.xlu1 %981  ;;  %v994_v10 = vpop.permute.xlu0 %993 }
 0x127   : > { %1163 = vst [vmem:[%s2216_s4 + $0x18] sm:$0xff] %v1131_v38  ;;  %1166 = vst [vmem:[%s2216_s4 + $0x30] sm:$0xff] %v1134_v39  ;;  %v1101_v0 = vmul.f32 %v2202_v31, %v982_v21  ;;  %v1104_v42 = vmul.f32 %v2202_v31, %v994_v10 }
 0x129   : > { %v1133_v58 = vmul.f32 %v1101_v0, %v2005_v44  ;;  %v1136_v40 = vmul.f32 %v1104_v42, %v2035_v24 }
 0x12a   : > { %v990_v19 = vpop.permute.xlu1 %989  ;;  %v1002_v48 = vpop.permute.xlu0 %1001 }
 0x12b   : > { %1165 = vst [vmem:[%s2216_s4 + $0x28] sm:$0xff] %v1133_v58  ;;  %1168 = vst [vmem:[%s2216_s4 + $0x40] sm:$0xff] %v1136_v40  ;;  %v1103_v28 = vmul.f32 %v2202_v31, %v990_v19  ;;  %v1106_v52 = vmul.f32 %v2202_v31, %v1002_v48 }
 0x12d   : > { %v1135_v17 = vmul.f32 %v1103_v28, %v2026_v57  ;;  %v1138_v56 = vmul.f32 %v1106_v52, %v2055_v32 }
 0x12e   : > { %v998_v27 = vpop.permute.xlu1 %997  ;;  %v1010_v6 = vpop.permute.xlu0 %1009 }
 0x12f   : > { %1167 = vst [vmem:[%s2216_s4 + $0x38] sm:$0xff] %v1135_v17  ;;  %1170 = vst [vmem:[%s2216_s4 + $0x50] sm:$0xff] %v1138_v56  ;;  %v1105_v44 = vmul.f32 %v2202_v31, %v998_v27  ;;  %v1108_v24 = vmul.f32 %v2202_v31, %v1010_v6 }
 0x131   : > { %v1137_v33 = vmul.f32 %v1105_v44, %v2044_v29  ;;  %v1140_v41 = vmul.f32 %v1108_v24, %v2072_v37 }
 0x132   : > { %v1006_v26 = vpop.permute.xlu1 %1005  ;;  %v1018_v12 = vpop.permute.xlu0 %1017 }
 0x133   : > { %1169 = vst [vmem:[%s2216_s4 + $0x48] sm:$0xff] %v1137_v33  ;;  %1172 = vst [vmem:[%s2216_s4 + $0x60] sm:$0xff] %v1140_v41  ;;  %v1107_v57 = vmul.f32 %v2202_v31, %v1006_v26  ;;  %v1110_v32 = vmul.f32 %v2202_v31, %v1018_v12 }
 0x135   : > { %v1139_v4 = vmul.f32 %v1107_v57, %v2062_v46  ;;  %v1142_v25 = vmul.f32 %v1110_v32, %v2092_v1 }
 0x136   : > { %v1014_v61 = vpop.permute.xlu1 %1013  ;;  %v1026_v29 = vpop.permute.xlu0 %1025 }
 0x137   : > { %1171 = vst [vmem:[%s2216_s4 + $0x58] sm:$0xff] %v1139_v4  ;;  %1174 = vst [vmem:[%s2216_s4 + $0x70] sm:$0xff] %v1142_v25  ;;  %v1109_v37 = vmul.f32 %v2202_v31, %v1014_v61  ;;  %v1112_v18 = vmul.f32 %v2253_v34, %v1026_v29 }
 0x139   : > { %v1141_v50 = vmul.f32 %v1109_v37, %v2080_v43  ;;  %v1144_v13 = vmul.f32 %v1112_v18, %v2110_v45 }
 0x13a   : > { %v1022_v49 = vpop.permute.xlu1 %1021  ;;  %v1034_v2 = vpop.permute.xlu0 %1033 }
 0x13b   : > { %1173 = vst [vmem:[%s2216_s4 + $0x68] sm:$0xff] %v1141_v50  ;;  %1176 = vst [vmem:[%s2216_s4 + $0x80] sm:$0xff] %v1144_v13  ;;  %v1111_v46 = vmul.f32 %v2202_v31, %v1022_v49  ;;  %v1114_v1 = vmul.f32 %v2253_v34, %v1034_v2 }
 0x13d   : > { %v1143_v36 = vmul.f32 %v1111_v46, %v2101_v14  ;;  %v1146_v11 = vmul.f32 %v1114_v1, %v2126_v51 }
 0x13e   : > { %v1030_v54 = vpop.permute.xlu1 %1029  ;;  %v1042_v22 = vpop.permute.xlu0 %1041 }
 0x13f   : > { %1175 = vst [vmem:[%s2216_s4 + $0x78] sm:$0xff] %v1143_v36  ;;  %1178 = vst [vmem:[%s2216_s4 + $0x90] sm:$0xff] %v1146_v11  ;;  %v1113_v43 = vmul.f32 %v2253_v34, %v1030_v54  ;;  %v1116_v45 = vmul.f32 %v2253_v34, %v1042_v22 }
 0x141   : > { %v1145_v35 = vmul.f32 %v1113_v43, %v2112_v55  ;;  %v1148_v31 = vmul.f32 %v1116_v45, %v2140_v23 }
 0x142   : > { %v1038_v30 = vpop.permute.xlu1 %1037  ;;  %v1050_v8 = vpop.permute.xlu0 %1049 }
 0x143   : > { %1177 = vst [vmem:[%s2216_s4 + $0x88] sm:$0xff] %v1145_v35  ;;  %1180 = vst [vmem:[%s2216_s4 + $0xa0] sm:$0xff] %v1148_v31  ;;  %v1115_v14 = vmul.f32 %v2253_v34, %v1038_v30  ;;  %v1118_v51 = vmul.f32 %v2253_v34, %v1050_v8 }
 0x145   : > { %v1147_v47 = vmul.f32 %v1115_v14, %v2131_v60  ;;  %v1150_v38 = vmul.f32 %v1118_v51, %v2156_v15 }
 0x146   : > { %v1046_v39 = vpop.permute.xlu1 %1045  ;;  %v1058_v21 = vpop.permute.xlu0 %1057 }
 0x147   : > { %1179 = vst [vmem:[%s2216_s4 + $0x98] sm:$0xff] %v1147_v47  ;;  %1182 = vst [vmem:[%s2216_s4 + $0xb0] sm:$0xff] %v1150_v38  ;;  %v1117_v55 = vmul.f32 %v2253_v34, %v1046_v39  ;;  %v1120_v23 = vmul.f32 %v2253_v34, %v1058_v21 }
 0x149   : > { %v1149_v10 = vmul.f32 %v1117_v55, %v2142_v7  ;;  %v1152_v0 = vmul.f32 %v1120_v23, %v2170_v53 }
 0x14a   : > { %v1054_v42 = vpop.permute.xlu1 %1053  ;;  %v1066_v58 = vpop.permute.xlu0 %1065 }
 0x14b   : > { %1181 = vst [vmem:[%s2216_s4 + $0xa8] sm:$0xff] %v1149_v10  ;;  %1184 = vst [vmem:[%s2216_s4 + $0xc0] sm:$0xff] %v1152_v0  ;;  %v1119_v60 = vmul.f32 %v2253_v34, %v1054_v42  ;;  %v1122_v15 = vmul.f32 %v2253_v34, %v1066_v58 }
 0x14d   : > { %v1151_v40 = vmul.f32 %v1119_v60, %v2161_v20  ;;  %v1154_v19 = vmul.f32 %v1122_v15, %v2183_v62 }
 0x14e   : > { %v1062_v48 = vpop.permute.xlu1 %1061  ;;  %v1074_v28 = vpop.permute.xlu0 %1073 }
 0x14f   : > { %1183 = vst [vmem:[%s2216_s4 + $0xb8] sm:$0xff] %v1151_v40  ;;  %1186 = vst [vmem:[%s2216_s4 + $0xd0] sm:$0xff] %v1154_v19  ;;  %v1121_v7 = vmul.f32 %v2253_v34, %v1062_v48  ;;  %v1124_v53 = vmul.f32 %v2253_v34, %v1074_v28 }
 0x151   : > { %v1153_v52 = vmul.f32 %v1121_v7, %v2172_v16  ;;  %v1156_v17 = vmul.f32 %v1124_v53, %v2196_v9 }
 0x152   : > { %v1070_v56 = vpop.permute.xlu1 %1069  ;;  %v1082_v20 = vpop.permute.xlu0 %1081 }
 0x153   : > { %1185 = vst [vmem:[%s2216_s4 + $0xc8] sm:$0xff] %v1153_v52  ;;  %1188 = vst [vmem:[%s2216_s4 + $0xe0] sm:$0xff] %v1156_v17  ;;  %v1123_v62 = vmul.f32 %v2253_v34, %v1070_v56  ;;  %v1126_v27 = vmul.f32 %v2253_v34, %v1082_v20 }
 0x155   : > { %v1155_v6 = vmul.f32 %v1123_v62, %v2186_v63  ;;  %v1158_v44 = vmul.f32 %v1126_v27, %v2210_v3 }
 0x156   : > { %v1078_v24 = vpop.permute.xlu1 %1077 }
 0x157   : > { %1187 = vst [vmem:[%s2216_s4 + $0xd8] sm:$0xff] %v1155_v6  ;;  %1190 = vst [vmem:[%s2216_s4 + $0xf0] sm:$0xff] %v1158_v44  ;;  %v1125_v16 = vmul.f32 %v2253_v34, %v1078_v24 }
 0x159   : > { %v1157_v9 = vmul.f32 %v1125_v16, %v2198_v59 }
 0x15a   : > { %v1086_v33 = vpop.permute.xlu1 %1085 }
 0x15b   : > { %1189 = vst [vmem:[%s2216_s4 + $0xe8] sm:$0xff] %v1157_v9  ;;  %v1127_v41 = vmul.f32 %v2253_v34, %v1086_v33 }
 0x15d   : > { %v1159_v63 = vmul.f32 %v1127_v41, %v2212_v5 }
 0x15f   : > { %1191 = vst [vmem:[%s2216_s4 + $0xf8] sm:$0xff] %v1159_v63 }
 0x160   : > { %1498 = shalt.err (!%p1495_p3)
}
 0x161   : > { %s1499_s23 = scalar_lea.hbm %s2316_s14, 4096  ;;  %s1503_s26 = scalar_lea.hbm %s2367_s2, 8192 }
 0x162   : > { %p1500_p4 = scmp.ne.s32.totalorder %s2316_s14, %s1499_s23  ;;  %p1504_p9 = scmp.lt.u32.totalorder %s2316_s14, %s2367_s2 }
 0x163   : > { %p1505_p10 = scmp.lt.u32.totalorder %s1503_s26, %s1499_s23  ;;  %p1507_p12 = scmp.lt.u32.totalorder %s1499_s23, %s2316_s14 }
 0x164   : > { %p1501_p7 = pnand %p1500_p4, %p1609_p5 }
 0x165   : > { %p1506_p11 = por %p1505_p10, %p1504_p9 }
 0x166   : > { %p1502_p8 = pneg %p1501_p7 }
 0x167   : > { %p1508_p13 = por %p1507_p12, %p1506_p11 }
 0x169   : > { %p1509_p0 = pnand %p1508_p13, %p1502_p8 }
 0x16b   : > { %1512 = shalt.err (!%p1509_p0)
}
 0x16c   : > { %s1554_s29 = smov 128   ;;  %s1555_s30 = smov 8  }
 0x16d   : > { %1370 = dma.vmem_to_hbm [thread:$0]  (%p1609_p5), %s2318_s6, 4096, %s2316_s14, %s2324_s13, %s1554_s29, %s1554_s29, %s1555_s30  }
 0x16e PF: > { %p1376_p1 = scmp.ge.s32.totalorder %s1547_s12, 2  ;;  %s1222_s3 = sand.u32 1, %s1535_s9  }
 0x16f   : > { %s1223_s4 = scalar_lea.sflag [#allocation3], %s1222_s3 }
 0x170   : > { %p1373_p2 = pnand %p1376_p1, %p1613_p6 }
 0x172   : > { %1530 = dma.done.wait (!%p1373_p2), %s1223_s4, 4096  }
 0x173   : > { %1532 = vsyncadd (!%p1373_p2), %s1223_s4, 4294963200  ;;  %p12_p3 = scmp.ge.s32.totalorder %s1596_s15, 4   ;;  %s2370_s9 = smov %s1539_s10 }
 0x174   : > { %s2371_s10 = smov %s1543_s11  ;;  %s2372_s11 = smov %s1607_s18 }
 0x175   : > { %s2373_s12 = smov %s1596_s15  ;;  %14 = sbr.rel (!%p12_p3) target bundleno = 3 (0x3), region = 66 }
 0x17c   :  { %1228 = vsyncpa [#allocation3], 1 }
 0x17d   :  { %1230 = vsyncpa [#allocation3 + $0x1], 1 }

</bundles_post_ra>
